<compile_context>
chip_gen: v7x
topology: tpu7x:2x2x1
jax: 0.10.0
libtpu: 0.0.40
codegen_flags: <defaults>
</compile_context>

<pallas_src>
import jax
import jax.numpy as jnp
from jax.experimental import pallas as pl
from jax.experimental.pallas import tpu as pltpu

EPSILON = 1e-6
_LANE = 128
_MAX_ROW_BLOCK = 256      # rows per grid block cap (bounds tiles & accumulators)
_MAX_SUB_CHUNKS = 8       # statically unrolled sub-chunks per spatial tile
_MIN_SUB_WIDTH = 512      # lanes per sub-chunk (lower bound)


def _pow2_floor(x):
    return 1 << (int(x).bit_length() - 1)


def _vmem_capacity_bytes():
    try:
        return int(pltpu.get_tpu_info().vmem_capacity_bytes)
    except Exception:
        return 64 * 1024 * 1024  # conservative fallback (v7x-sized)


def _choose_row_block(r):
    """Rows per grid block: full extent for tiny R, otherwise a multiple of 8
    sublanes, split so there are >= 2 row blocks (v7x has two TensorCores)."""
    if r <= 8:
        return r
    half = -(-r // 2)
    rb = -(-half // 8) * 8
    return min(rb, _MAX_ROW_BLOCK)


def _make_iou_kernel(rb, ts, cw, n_sub, n_steps, s_real, ragged):
    def accumulate(inter_acc, sq_acc, p_ref, t_ref, k, c, masked):
        off = c * cw  # static python int -> static slice, zero runtime cost
        p = p_ref[:, off:off + cw].astype(jnp.float32)
        t = t_ref[:, off:off + cw].astype(jnp.float32)
        tp = t * p
        sq = t * t + p * p
        if masked:
            # Last spatial tile may overhang S; zero the overhang columns.
            col = jax.lax.broadcasted_iota(jnp.int32, (rb, cw), 1) + (k * ts + off)
            keep = col < s_real
            zero = jnp.zeros_like(tp)
            tp = jnp.where(keep, tp, zero)
            sq = jnp.where(keep, sq, zero)
        inter_acc[...] += tp
        sq_acc[...] += sq

    def kernel(p_ref, t_ref, inter_out, sq_out, inter_acc, sq_acc):
        k = pl.program_id(1)

        @pl.when(k == 0)
        def _init():
            inter_acc[...] = jnp.zeros_like(inter_acc)
            sq_acc[...] = jnp.zeros_like(sq_acc)

        if ragged:
            @pl.when(k < n_steps - 1)
            def _steady():
                for c in range(n_sub):
                    accumulate(inter_acc, sq_acc, p_ref, t_ref, k, c, False)

            @pl.when(k == n_steps - 1)
            def _tail():
                for c in range(n_sub):
                    accumulate(inter_acc, sq_acc, p_ref, t_ref, k, c, True)
        else:
            for c in range(n_sub):
                accumulate(inter_acc, sq_acc, p_ref, t_ref, k, c, False)

        @pl.when(k == n_steps - 1)
        def _finish():
            # One cheap cross-lane reduction per row block, in the epilogue.
            inter_out[...] = jnp.sum(inter_acc[...], axis=-1, keepdims=True)
            sq_out[...] = jnp.sum(sq_acc[...], axis=-1, keepdims=True)

    return kernel


@jax.jit
def iou_loss(y_pred, y_true):
    assert y_pred.shape == y_true.shape
    n, c, h, w = y_pred.shape
    r = n * c
    s = h * w
    assert r >= 1 and s >= 1

    p2d = y_pred.reshape(r, s)
    t2d = y_true.reshape(r, s)
    itemsize = jnp.dtype(y_pred.dtype).itemsize

    # ---- per-generation VMEM budgets --------------------------------------
    vmem_cap = _vmem_capacity_bytes()
    input_budget = vmem_cap // 3                       # 2 inputs x 2 buffers
    vmem_limit = min((vmem_cap * 3) // 4, 112 * 1024 * 1024)

    # ---- row blocking ------------------------------------------------------
    rb = _choose_row_block(r)
    nrb = -(-r // rb)
    r_pad = nrb * rb

    # ---- spatial tiling (no wrapper-side padding / input copies) ----------
    if s <= _LANE:
        ts = s            # full-extent lane dim (exempt from 128 rule)
        cw = s
        n_sub = 1
    else:
        # Every block must start in-bounds -> cap at floor(S / 128) chunks.
        chunks_cap = max(1, s // _LANE)
        budget_chunks = max(1, input_budget // (4 * rb * _LANE * itemsize))
        chunks = _pow2_floor(min(chunks_cap, budget_chunks))
        ts = chunks * _LANE
        # Sub-chunk width: at most _MAX_SUB_CHUNKS statically unrolled chunks.
        cw = min(ts, max(_MIN_SUB_WIDTH, ts // _MAX_SUB_CHUNKS))
        n_sub = ts // cw

    n_steps = -(-s // ts)
    ragged = (s % ts) != 0

    kernel = _make_iou_kernel(rb, ts, cw, n_sub, n_steps, s, ragged)

    inter, sq = pl.pallas_call(
        kernel,
        out_shape=(jax.ShapeDtypeStruct((r_pad, 1), jnp.float32),
                   jax.ShapeDtypeStruct((r_pad, 1), jnp.float32)),
        grid_spec=pltpu.PrefetchScalarGridSpec(
            num_scalar_prefetch=0,
            grid=(nrb, n_steps),
            in_specs=[
                pl.BlockSpec((rb, ts), lambda ri, k: (ri, k)),
                pl.BlockSpec((rb, ts), lambda ri, k: (ri, k)),
            ],
            out_specs=[
                pl.BlockSpec((rb, 1), lambda ri, k: (ri, 0)),
                pl.BlockSpec((rb, 1), lambda ri, k: (ri, 0)),
            ],
            scratch_shapes=[
                pltpu.VMEM((rb, cw), jnp.float32),
                pltpu.VMEM((rb, cw), jnp.float32),
            ],
        ),
        compiler_params=pltpu.CompilerParams(
            dimension_semantics=("parallel", "arbitrary"),
            vmem_limit_bytes=int(vmem_limit),
        ),
        cost_estimate=pl.CostEstimate(
            flops=6 * r * s,
            transcendentals=0,
            bytes_accessed=2 * r * s * itemsize + 8 * r_pad,
        ),
    )(p2d, t2d)

    # Tiny finalization in the wrapper (drops any padded overhang rows).
    inter = inter[:r, 0]
    sq = sq[:r, 0]
    union = sq - inter
    iou = (inter + EPSILON) / (union + EPSILON)
    return 1.0 - jnp.mean(iou)


def iou_loss_ref(y_pred, y_true):
    """Pure-JAX reference matching the PyTorch module."""
    op_sum = lambda x: x.sum(-1).sum(-1)
    inter = op_sum(y_true * y_pred)
    union = op_sum(y_true**2) + op_sum(y_pred**2) - op_sum(y_true * y_pred)
    iou = (inter + EPSILON) / (union + EPSILON)
    return 1.0 - jnp.mean(iou)


if __name__ == "__main__":
    key = jax.random.PRNGKey(0)

    cases = [
        ((2, 4, 16, 16), jnp.float32),   # baseline: clean tiling
        ((2, 4, 20, 20), jnp.float32),   # ragged spatial tail (S = 400)
        ((3, 5, 16, 16), jnp.float32),   # R = 15 -> row blocking + row overhang
        ((2, 4, 16, 16), jnp.bfloat16),  # bf16 inputs
    ]
    for i, (shape, dtype) in enumerate(cases):
        k1, k2 = jax.random.split(jax.random.fold_in(key, i))
        y_pred = jax.nn.sigmoid(
            jax.random.normal(k1, shape, dtype=jnp.float32)).astype(dtype)
        y_true = jax.nn.sigmoid(
            jax.random.normal(k2, shape, dtype=jnp.float32)).astype(dtype)

        loss = jax.block_until_ready(iou_loss(y_pred, y_true))
        ref = jax.block_until_ready(
            iou_loss_ref(y_pred.astype(jnp.float32),
                         y_true.astype(jnp.float32)))

        assert loss.shape == ()
        assert jnp.allclose(loss, ref, rtol=1e-5, atol=1e-6), (shape, dtype, loss, ref)

    print("KERNEL_OK")
</pallas_src>

<mosaic_0001>
module attributes {stable_mosaic.version = 11 : i64} {
  func.func @kernel(%arg0: i32, %arg1: i32, %arg2: memref<8x256xf32, #tpu.memory_space<vmem>>, %arg3: memref<8x256xf32, #tpu.memory_space<vmem>>, %arg4: memref<8x1xf32, #tpu.memory_space<vmem>>, %arg5: memref<8x1xf32, #tpu.memory_space<vmem>>, %arg6: memref<8x256xf32, #tpu.memory_space<vmem>>, %arg7: memref<8x256xf32, #tpu.memory_space<vmem>>) attributes {dimension_semantics = [#tpu.dimension_semantics<parallel>, #tpu.dimension_semantics<arbitrary>], iteration_bounds = array<i64: 1, 1>, scalar_prefetch = 0 : i64, scratch_operands = 2 : i64, tpu.core_type = #tpu.core_type<tc>, window_params = [{transform_indices = @transform_0, window_bounds = array<i64: 8, 256>}, {transform_indices = @transform_1, window_bounds = array<i64: 8, 256>}, {transform_indices = @transform_2, window_bounds = array<i64: 8, 1>}, {transform_indices = @transform_3, window_bounds = array<i64: 8, 1>}]} {
    %c0_i32 = arith.constant 0 : i32
    %0 = arith.cmpi eq, %arg1, %c0_i32 : i32
    %1 = arith.extui %0 : i1 to i32
    %c0_i32_0 = arith.constant 0 : i32
    %2 = arith.cmpi ne, %1, %c0_i32_0 : i32
    scf.if %2 {
      %cst = arith.constant 0.000000e+00 : f32
      %18 = vector.broadcast %cst : f32 to vector<8x256xf32>
      %c0_14 = arith.constant 0 : index
      %c0_15 = arith.constant 0 : index
      %19 = vector.load %arg6[%c0_14, %c0_15] : memref<8x256xf32, #tpu.memory_space<vmem>>, vector<8x256xf32>
      tpu.vector_store %arg6[%c0_14, %c0_15], %18 {strides = array<i32>} : memref<8x256xf32, #tpu.memory_space<vmem>>, vector<8x256xf32>,
      %cst_16 = arith.constant 0.000000e+00 : f32
      %20 = vector.broadcast %cst_16 : f32 to vector<8x256xf32>
      %c0_17 = arith.constant 0 : index
      %c0_18 = arith.constant 0 : index
      %21 = vector.load %arg7[%c0_17, %c0_18] : memref<8x256xf32, #tpu.memory_space<vmem>>, vector<8x256xf32>
      tpu.vector_store %arg7[%c0_17, %c0_18], %20 {strides = array<i32>} : memref<8x256xf32, #tpu.memory_space<vmem>>, vector<8x256xf32>,
    } else {
    }
    %c0 = arith.constant 0 : index
    %c0_1 = arith.constant 0 : index
    %3 = vector.load %arg2[%c0, %c0_1] : memref<8x256xf32, #tpu.memory_space<vmem>>, vector<8x256xf32>
    %c0_2 = arith.constant 0 : index
    %c0_3 = arith.constant 0 : index
    %4 = vector.load %arg3[%c0_2, %c0_3] : memref<8x256xf32, #tpu.memory_space<vmem>>, vector<8x256xf32>
    %5 = arith.mulf %4, %3 : vector<8x256xf32>
    %6 = arith.mulf %4, %4 : vector<8x256xf32>
    %7 = arith.mulf %3, %3 : vector<8x256xf32>
    %8 = arith.addf %6, %7 : vector<8x256xf32>
    %c0_4 = arith.constant 0 : index
    %c0_5 = arith.constant 0 : index
    %9 = vector.load %arg6[%c0_4, %c0_5] : memref<8x256xf32, #tpu.memory_space<vmem>>, vector<8x256xf32>
    %10 = arith.addf %9, %5 : vector<8x256xf32>
    %c0_6 = arith.constant 0 : index
    %c0_7 = arith.constant 0 : index
    %11 = vector.load %arg6[%c0_6, %c0_7] : memref<8x256xf32, #tpu.memory_space<vmem>>, vector<8x256xf32>
    tpu.vector_store %arg6[%c0_6, %c0_7], %10 {strides = array<i32>} : memref<8x256xf32, #tpu.memory_space<vmem>>, vector<8x256xf32>,
    %c0_8 = arith.constant 0 : index
    %c0_9 = arith.constant 0 : index
    %12 = vector.load %arg7[%c0_8, %c0_9] : memref<8x256xf32, #tpu.memory_space<vmem>>, vector<8x256xf32>
    %13 = arith.addf %12, %8 : vector<8x256xf32>
    %c0_10 = arith.constant 0 : index
    %c0_11 = arith.constant 0 : index
    %14 = vector.load %arg7[%c0_10, %c0_11] : memref<8x256xf32, #tpu.memory_space<vmem>>, vector<8x256xf32>
    tpu.vector_store %arg7[%c0_10, %c0_11], %13 {strides = array<i32>} : memref<8x256xf32, #tpu.memory_space<vmem>>, vector<8x256xf32>,
    %c0_i32_12 = arith.constant 0 : i32
    %15 = arith.cmpi eq, %arg1, %c0_i32_12 : i32
    %16 = arith.extui %15 : i1 to i32
    %c0_i32_13 = arith.constant 0 : i32
    %17 = arith.cmpi ne, %16, %c0_i32_13 : i32
    scf.if %17 {
      %c0_14 = arith.constant 0 : index
      %c0_15 = arith.constant 0 : index
      %18 = vector.load %arg6[%c0_14, %c0_15] : memref<8x256xf32, #tpu.memory_space<vmem>>, vector<8x256xf32>
      %cst = arith.constant dense<0.000000e+00> : vector<8xf32>
      %19 = vector.multi_reduction <add>, %18, %cst [1] : vector<8x256xf32> to vector<8xf32>
      %20 = vector.shape_cast %19 : vector<8xf32> to vector<8x1xf32>
      %c0_16 = arith.constant 0 : index
      %c0_17 = arith.constant 0 : index
      %21 = vector.load %arg4[%c0_16, %c0_17] : memref<8x1xf32, #tpu.memory_space<vmem>>, vector<8x1xf32>
      tpu.vector_store %arg4[%c0_16, %c0_17], %20 {strides = array<i32>} : memref<8x1xf32, #tpu.memory_space<vmem>>, vector<8x1xf32>,
      %c0_18 = arith.constant 0 : index
      %c0_19 = arith.constant 0 : index
      %22 = vector.load %arg7[%c0_18, %c0_19] : memref<8x256xf32, #tpu.memory_space<vmem>>, vector<8x256xf32>
      %cst_20 = arith.constant dense<0.000000e+00> : vector<8xf32>
      %23 = vector.multi_reduction <add>, %22, %cst_20 [1] : vector<8x256xf32> to vector<8xf32>
      %24 = vector.shape_cast %23 : vector<8xf32> to vector<8x1xf32>
      %c0_21 = arith.constant 0 : index
      %c0_22 = arith.constant 0 : index
      %25 = vector.load %arg5[%c0_21, %c0_22] : memref<8x1xf32, #tpu.memory_space<vmem>>, vector<8x1xf32>
      tpu.vector_store %arg5[%c0_21, %c0_22], %24 {strides = array<i32>} : memref<8x1xf32, #tpu.memory_space<vmem>>, vector<8x1xf32>,
    } else {
    }
    return
  }
  func.func @transform_0(%arg0: i32, %arg1: i32) -> (i32, i32) {
    %c0_i32 = arith.constant 0 : i32
    return %arg0, %arg1 : i32, i32
  }
  func.func @transform_1(%arg0: i32, %arg1: i32) -> (i32, i32) {
    %c0_i32 = arith.constant 0 : i32
    return %arg0, %arg1 : i32, i32
  }
  func.func @transform_2(%arg0: i32, %arg1: i32) -> (i32, i32) {
    %c0_i32 = arith.constant 0 : i32
    %c0_i32_0 = arith.constant 0 : i32
    return %arg0, %c0_i32 : i32, i32
  }
  func.func @transform_3(%arg0: i32, %arg1: i32) -> (i32, i32) {
    %c0_i32 = arith.constant 0 : i32
    %c0_i32_0 = arith.constant 0 : i32
    return %arg0, %c0_i32 : i32, i32
  }
}

</mosaic_0001>

<bundles_post_ra>
// kernel: iou_loss.1
= control target key start
LH: loop header
LB: loop body
LE: loop exit
PB: predicated region body
PF: predicated region fallthrough
CT: control target
= control target key end

     0   :  { %vm53_vm0 = vcmask 7168   ;;  %s107_s0 = inlined_call_operand.vmem [shape: f32[8,256], index: 0, kind: input, shape index: {}]   ;;  %s108_s1 = inlined_call_operand.vmem [shape: f32[8,256], index: 1, kind: input, shape index: {}]   ;;  %s109_s2 = inlined_call_operand.vmem [shape: f32[8,1], index: 2, kind: output, shape index: {0}]   ;;  %s110_s3 = inlined_call_operand.vmem [shape: f32[8,1], index: 3, kind: output, shape index: {1}]  }
   0x1   :  { %v21_v0 = vld [vmem:[%s107_s0] sm:$0xff]  ;;  %v22_v1 = vld [vmem:[%s107_s0 + $0x8] sm:$0xff] }
   0x2   :  { %v23_v2 = vld [vmem:[%s108_s1] sm:$0xff]  ;;  %v24_v3 = vld [vmem:[%s108_s1 + $0x8] sm:$0xff]  ;;  %v29_v6 = vmul.f32 %v21_v0, %v21_v0  ;;  %v30_v7 = vmul.f32 %v22_v1, %v22_v1 }
   0x3   :  { %v25_v4 = vmul.f32 %v23_v2, %v21_v0  ;;  %v27_v5 = vmul.f32 %v23_v2, %v23_v2  ;;  %v26_v8 = vmul.f32 %v24_v3, %v22_v1  ;;  %v28_v9 = vmul.f32 %v24_v3, %v24_v3 }
   0x5   :  { %v31_v10 = vadd.f32 %v29_v6, %v27_v5  ;;  %v50_v11 = vadd.f32 %v26_v8, %v25_v4  ;;  %v32_v12 = vadd.f32 %v30_v7, %v28_v9 }
   0x7   :  { %51 = vadd.xlane.f32.xlu0 %v50_v11  ;;  %v57_v13 = vadd.f32 %v32_v12, %v31_v10 }
   0xb   :  { %58 = vadd.xlane.f32.xlu0 %v57_v13 }
  0x94   :  { %v52_v14 = vpop.xlane.xlu0 %51 }
  0x95   :  { %54 = vst.msk [vmem:[%s109_s2] sm:$0xff] %vm53_vm0, %v52_v14 }
  0x98   :  { %v59_v15 = vpop.xlane.xlu0 %58 }
  0x99   :  { %60 = vst.msk [vmem:[%s110_s3] sm:$0xff] %vm53_vm0, %v59_v15 }

</bundles_post_ra>
